<compile_context>
chip_gen: v7x
topology: tpu7x:2x2x1
jax: 0.10.0
libtpu: 0.0.40
codegen_flags: <defaults>
</compile_context>

<pallas_src>
import jax
import jax.numpy as jnp
from jax.experimental import pallas as pl
from jax.experimental.pallas import tpu as pltpu


def _round_up(x, m):
    return -(-x // m) * m


def setie_kernel(h_ref, wq_ref, bq_ref, wfc_ref, bfc_ref, logits_ref, smt_ref):
    # h_ref:      (TB, S, H)   hidden-state tile (TB batch elements per step)
    # wq_ref:     (H, KP)      stacked, pre-transposed, zero-padded query weights
    #                          cols [0:K) = start queries, cols [KE:KE+K) = end queries
    # bq_ref:     (1, KP)      stacked query biases (same column layout)
    # wfc_ref:    (H, CP)      fc weight, zero-padded to lane-dense CP columns
    # bfc_ref:    (1, CP)      fc bias, zero-padded
    # logits_ref: (TB, K, CP)  fc(temp_start + temp_end), padded columns
    # smt_ref:    (TB, KP, S)  softmax already in (query, seq) layout;
    #                          rows [0:K) = pred_start, rows [KE:KE+K) = pred_end
    TB = h_ref.shape[0]
    K = logits_ref.shape[1]
    KE = _round_up(K, 8)

    # Grid-invariant weights: load once per grid step, hoisted out of the TB loop.
    wq = wq_ref[...]
    bq = bq_ref[...]
    wfc = wfc_ref[...]
    bfc = bfc_ref[...]

    for b in range(TB):  # static (unrolled) loop over the batch tile
        hb = h_ref[b]                                                    # (S, H)

        # Fused start+end query logits: one MXU call for all 2K queries.
        lg = jnp.dot(hb, wq, preferred_element_type=jnp.float32) + bq    # (S, KP)

        # One softmax pass over the sequence axis for every query column.
        m = jnp.max(lg, axis=0, keepdims=True)                           # (1, KP)
        e = jnp.exp(lg - m)
        inv = pl.reciprocal(jnp.sum(e, axis=0, keepdims=True))           # (1, KP)
        sm = e * inv                                                     # (S, KP)

        # Single relayout to (KP, S), reused for the dot AND the writeback.
        smT = sm.T                                                       # (KP, S)
        smt_ref[b] = smT

        # weighted_sum(hidden, softmax): (KP, S) @ (S, H) -> (KP, H)
        temp = jnp.dot(smT, hb, preferred_element_type=jnp.float32)
        fc_in = temp[:K, :] + temp[KE:KE + K, :]                         # (K, H)

        # fc(temp_start + temp_end) -> (K, CP); lane-dense store.
        logits_ref[b] = (jnp.dot(fc_in, wfc, preferred_element_type=jnp.float32)
                         + bfc)


def setie_forward(hidden_states, w_start, b_start, w_end, b_end, w_fc, b_fc,
                  *, tb=None):
    """hidden_states: (B, S, H) f32.  Returns dict of pred_logits/pred_start/pred_end."""
    B, S, H = hidden_states.shape
    K = w_start.shape[0]
    C = w_fc.shape[1]

    f32 = jnp.float32
    KE = _round_up(K, 8)              # sublane-aligned offset of the end-query block
    KP = _round_up(KE + K, 128)       # lane-padded stacked query width
    CP = _round_up(C, 128)            # lane-padded fc width

    # Stack + pre-transpose + zero-pad the query weights once (free XLA work).
    wq = jnp.zeros((H, KP), f32)
    wq = wq.at[:, :K].set(w_start.T.astype(f32))
    wq = wq.at[:, KE:KE + K].set(w_end.T.astype(f32))
    bq = jnp.zeros((1, KP), f32)
    bq = bq.at[0, :K].set(b_start.astype(f32))
    bq = bq.at[0, KE:KE + K].set(b_end.astype(f32))
    wfc_p = jnp.zeros((H, CP), f32).at[:, :C].set(w_fc.astype(f32))
    bfc_p = jnp.zeros((1, CP), f32).at[0, :C].set(b_fc.astype(f32))

    # Batch tile: amortize per-grid-step overhead, but keep >= 2 grid steps
    # where possible so both v7x TensorCores get work.
    if tb is None:
        tb = max(1, min(8, B // 2))
    Bp = pl.cdiv(B, tb) * tb
    h = hidden_states.astype(f32)
    if Bp != B:
        h = jnp.pad(h, ((0, Bp - B), (0, 0), (0, 0)))

    logits_p, smt = pl.pallas_call(
        setie_kernel,
        out_shape=(
            jax.ShapeDtypeStruct((Bp, K, CP), f32),
            jax.ShapeDtypeStruct((Bp, KP, S), f32),
        ),
        grid_spec=pltpu.PrefetchScalarGridSpec(
            num_scalar_prefetch=0,
            grid=(Bp // tb,),
            in_specs=[
                pl.BlockSpec((tb, S, H), lambda b: (b, 0, 0)),
                pl.BlockSpec((H, KP), lambda b: (0, 0)),
                pl.BlockSpec((1, KP), lambda b: (0, 0)),
                pl.BlockSpec((H, CP), lambda b: (0, 0)),
                pl.BlockSpec((1, CP), lambda b: (0, 0)),
            ],
            out_specs=[
                pl.BlockSpec((tb, K, CP), lambda b: (b, 0, 0)),
                pl.BlockSpec((tb, KP, S), lambda b: (b, 0, 0)),
            ],
        ),
        compiler_params=pltpu.CompilerParams(
            dimension_semantics=("parallel",)),
    )(h, wq, bq, wfc_p, bfc_p)

    pred_logits = logits_p[:B, :, :C]
    pred_start = smt[:B, :K, :]
    pred_end = smt[:B, KE:KE + K, :]
    return {"pred_logits": pred_logits,
            "pred_start": pred_start,
            "pred_end": pred_end}


def setie_forward_ref(hidden_states, w_start, b_start, w_end, b_end, w_fc, b_fc):
    """Pure-JAX reference mirroring the PyTorch list-comprehension semantics."""
    ls = jnp.einsum("bsh,kh->bsk", hidden_states, w_start) + b_start
    le = jnp.einsum("bsh,kh->bsk", hidden_states, w_end) + b_end
    ss = jax.nn.softmax(ls, axis=1)   # softmax over sequence dim
    se = jax.nn.softmax(le, axis=1)
    temp_start = jnp.einsum("bsk,bsh->bkh", ss, hidden_states)
    temp_end = jnp.einsum("bsk,bsh->bkh", se, hidden_states)
    pred = jnp.einsum("bkh,hc->bkc", temp_start + temp_end, w_fc) + b_fc
    return {"pred_logits": pred,
            "pred_start": jnp.transpose(ss, (0, 2, 1)),
            "pred_end": jnp.transpose(se, (0, 2, 1))}


if __name__ == "__main__":
    # Small, forward-consistent shapes: k_query=20, y_num=39, y_len=S=35, hidden=32.
    B, S, H = 2, 35, 32
    K, Y_NUM = 20, 39
    C = Y_NUM + 1

    key = jax.random.PRNGKey(0)
    k = jax.random.split(key, 8)
    hidden_states = jax.random.normal(k[0], (B, S, H), dtype=jnp.float32)
    w_start = jax.random.normal(k[1], (K, H), dtype=jnp.float32) * 0.05
    b_start = jax.random.normal(k[2], (K,), dtype=jnp.float32) * 0.05
    w_end = jax.random.normal(k[3], (K, H), dtype=jnp.float32) * 0.05
    b_end = jax.random.normal(k[4], (K,), dtype=jnp.float32) * 0.05
    w_fc = jax.random.normal(k[5], (H, C), dtype=jnp.float32) * 0.05
    b_fc = jax.random.normal(k[6], (C,), dtype=jnp.float32) * 0.05

    # TODO(synk): BERT encoder, Hungarian matcher, and the matched cross-entropy
    # losses are not translated; the kernel covers the query/softmax/weighted-sum/fc
    # hot path that produces pred_logits / pred_start / pred_end.

    ref = setie_forward_ref(hidden_states, w_start, b_start, w_end, b_end, w_fc, b_fc)

    # Default tiling (tb=1 here, grid of B steps) and an explicit multi-example
    # tile (tb=2, single grid step) both validated against the reference.
    for tb in (None, 2):
        out = setie_forward(hidden_states, w_start, b_start, w_end, b_end,
                            w_fc, b_fc, tb=tb)
        jax.block_until_ready(out)
        for name in ("pred_logits", "pred_start", "pred_end"):
            assert out[name].shape == ref[name].shape, name
            assert jnp.allclose(out[name], ref[name], atol=1e-4, rtol=1e-4), name

    print("KERNEL_OK")
</pallas_src>

<mosaic_0001>
module attributes {stable_mosaic.version = 11 : i64} {
  func.func @setie_kernel(%arg0: i32, %arg1: memref<1x35x32xf32, #tpu.memory_space<vmem>>, %arg2: memref<32x128xf32, #tpu.memory_space<vmem>>, %arg3: memref<1x128xf32, #tpu.memory_space<vmem>>, %arg4: memref<32x128xf32, #tpu.memory_space<vmem>>, %arg5: memref<1x128xf32, #tpu.memory_space<vmem>>, %arg6: memref<1x20x128xf32, #tpu.memory_space<vmem>>, %arg7: memref<1x128x35xf32, #tpu.memory_space<vmem>>) attributes {dimension_semantics = [#tpu.dimension_semantics<parallel>], iteration_bounds = array<i64: 2>, scalar_prefetch = 0 : i64, scratch_operands = 0 : i64, tpu.core_type = #tpu.core_type<tc>, window_params = [{transform_indices = @transform_0, window_bounds = array<i64: 1, 35, 32>}, {pipeline_mode = #tpu.pipeline_mode<synchronous>, transform_indices = @transform_1, window_bounds = array<i64: 32, 128>}, {pipeline_mode = #tpu.pipeline_mode<synchronous>, transform_indices = @transform_2, window_bounds = array<i64: 1, 128>}, {pipeline_mode = #tpu.pipeline_mode<synchronous>, transform_indices = @transform_3, window_bounds = array<i64: 32, 128>}, {pipeline_mode = #tpu.pipeline_mode<synchronous>, transform_indices = @transform_4, window_bounds = array<i64: 1, 128>}, {transform_indices = @transform_5, window_bounds = array<i64: 1, 20, 128>}, {transform_indices = @transform_6, window_bounds = array<i64: 1, 128, 35>}]} {
    %c0 = arith.constant 0 : index
    %c0_0 = arith.constant 0 : index
    %0 = vector.load %arg2[%c0, %c0_0] : memref<32x128xf32, #tpu.memory_space<vmem>>, vector<32x128xf32>
    %c0_1 = arith.constant 0 : index
    %c0_2 = arith.constant 0 : index
    %1 = vector.load %arg3[%c0_1, %c0_2] : memref<1x128xf32, #tpu.memory_space<vmem>>, vector<1x128xf32>
    %c0_3 = arith.constant 0 : index
    %c0_4 = arith.constant 0 : index
    %2 = vector.load %arg4[%c0_3, %c0_4] : memref<32x128xf32, #tpu.memory_space<vmem>>, vector<32x128xf32>
    %c0_5 = arith.constant 0 : index
    %c0_6 = arith.constant 0 : index
    %3 = vector.load %arg5[%c0_5, %c0_6] : memref<1x128xf32, #tpu.memory_space<vmem>>, vector<1x128xf32>
    %c0_7 = arith.constant 0 : index
    %c0_8 = arith.constant 0 : index
    %c0_9 = arith.constant 0 : index
    %4 = vector.load %arg1[%c0_7, %c0_8, %c0_9] : memref<1x35x32xf32, #tpu.memory_space<vmem>>, vector<1x35x32xf32>
    %5 = vector.shape_cast %4 : vector<1x35x32xf32> to vector<35x32xf32>
    %cst = arith.constant dense<0.000000e+00> : vector<35x128xf32>
    %6 = tpu.matmul %5, %0, %cst {dimension_numbers = #tpu.dot_dimension_numbers<[1], [0], [0], [1], [0, 0, 1, 1], [], []>} : vector<35x32xf32>, vector<32x128xf32>, vector<35x128xf32> -> vector<35x128xf32>
    %7 = vector.broadcast %1 : vector<1x128xf32> to vector<35x128xf32>
    %8 = arith.addf %6, %7 : vector<35x128xf32>
    %cst_10 = arith.constant dense<0xFF800000> : vector<128xf32>
    %9 = vector.multi_reduction <maximumf>, %8, %cst_10 [0] : vector<35x128xf32> to vector<128xf32>
    %10 = vector.shape_cast %9 : vector<128xf32> to vector<1x128xf32>
    %11 = vector.broadcast %10 : vector<1x128xf32> to vector<35x128xf32>
    %12 = arith.subf %8, %11 : vector<35x128xf32>
    %13 = math.exp %12 : vector<35x128xf32>
    %cst_11 = arith.constant dense<0.000000e+00> : vector<128xf32>
    %14 = vector.multi_reduction <add>, %13, %cst_11 [0] : vector<35x128xf32> to vector<128xf32>
    %15 = vector.shape_cast %14 : vector<128xf32> to vector<1x128xf32>
    %16 = tpu.reciprocal %15 : vector<1x128xf32> -> vector<1x128xf32>
    %17 = vector.broadcast %16 : vector<1x128xf32> to vector<35x128xf32>
    %18 = arith.mulf %13, %17 : vector<35x128xf32>
    %19 = tpu.transpose %18, [1, 0] : vector<35x128xf32> -> vector<128x35xf32>
    %c0_12 = arith.constant 0 : index
    %c0_13 = arith.constant 0 : index
    %c0_14 = arith.constant 0 : index
    %20 = vector.load %arg7[%c0_12, %c0_13, %c0_14] : memref<1x128x35xf32, #tpu.memory_space<vmem>>, vector<1x128x35xf32>
    %21 = vector.shape_cast %20 : vector<1x128x35xf32> to vector<128x35xf32>
    %22 = vector.shape_cast %19 : vector<128x35xf32> to vector<1x128x35xf32>
    tpu.vector_store %arg7[%c0_12, %c0_13, %c0_14], %22 {strides = array<i32>} : memref<1x128x35xf32, #tpu.memory_space<vmem>>, vector<1x128x35xf32>,
    %cst_15 = arith.constant dense<0.000000e+00> : vector<128x32xf32>
    %23 = tpu.matmul %19, %5, %cst_15 {dimension_numbers = #tpu.dot_dimension_numbers<[1], [0], [0], [1], [0, 0, 1, 1], [], []>} : vector<128x35xf32>, vector<35x32xf32>, vector<128x32xf32> -> vector<128x32xf32>
    %24 = vector.extract_strided_slice %23 {offsets = [0, 0], sizes = [20, 32], strides = [1, 1]} : vector<128x32xf32> to vector<20x32xf32>
    %25 = vector.extract_strided_slice %23 {offsets = [24, 0], sizes = [20, 32], strides = [1, 1]} : vector<128x32xf32> to vector<20x32xf32>
    %26 = arith.addf %24, %25 : vector<20x32xf32>
    %cst_16 = arith.constant dense<0.000000e+00> : vector<20x128xf32>
    %27 = tpu.matmul %26, %2, %cst_16 {dimension_numbers = #tpu.dot_dimension_numbers<[1], [0], [0], [1], [0, 0, 1, 1], [], []>} : vector<20x32xf32>, vector<32x128xf32>, vector<20x128xf32> -> vector<20x128xf32>
    %28 = vector.broadcast %3 : vector<1x128xf32> to vector<20x128xf32>
    %29 = arith.addf %27, %28 : vector<20x128xf32>
    %c0_17 = arith.constant 0 : index
    %c0_18 = arith.constant 0 : index
    %c0_19 = arith.constant 0 : index
    %30 = vector.load %arg6[%c0_17, %c0_18, %c0_19] : memref<1x20x128xf32, #tpu.memory_space<vmem>>, vector<1x20x128xf32>
    %31 = vector.shape_cast %30 : vector<1x20x128xf32> to vector<20x128xf32>
    %32 = vector.shape_cast %29 : vector<20x128xf32> to vector<1x20x128xf32>
    tpu.vector_store %arg6[%c0_17, %c0_18, %c0_19], %32 {strides = array<i32>} : memref<1x20x128xf32, #tpu.memory_space<vmem>>, vector<1x20x128xf32>,
    return
  }
  func.func @transform_0(%arg0: i32) -> (i32, i32, i32) {
    %c0_i32 = arith.constant 0 : i32
    %c0_i32_0 = arith.constant 0 : i32
    %c0_i32_1 = arith.constant 0 : i32
    return %arg0, %c0_i32, %c0_i32_0 : i32, i32, i32
  }
  func.func @transform_1(%arg0: i32) -> (i32, i32) {
    %c0_i32 = arith.constant 0 : i32
    %c0_i32_0 = arith.constant 0 : i32
    %c0_i32_1 = arith.constant 0 : i32
    return %c0_i32, %c0_i32_0 : i32, i32
  }
  func.func @transform_2(%arg0: i32) -> (i32, i32) {
    %c0_i32 = arith.constant 0 : i32
    %c0_i32_0 = arith.constant 0 : i32
    %c0_i32_1 = arith.constant 0 : i32
    return %c0_i32, %c0_i32_0 : i32, i32
  }
  func.func @transform_3(%arg0: i32) -> (i32, i32) {
    %c0_i32 = arith.constant 0 : i32
    %c0_i32_0 = arith.constant 0 : i32
    %c0_i32_1 = arith.constant 0 : i32
    return %c0_i32, %c0_i32_0 : i32, i32
  }
  func.func @transform_4(%arg0: i32) -> (i32, i32) {
    %c0_i32 = arith.constant 0 : i32
    %c0_i32_0 = arith.constant 0 : i32
    %c0_i32_1 = arith.constant 0 : i32
    return %c0_i32, %c0_i32_0 : i32, i32
  }
  func.func @transform_5(%arg0: i32) -> (i32, i32, i32) {
    %c0_i32 = arith.constant 0 : i32
    %c0_i32_0 = arith.constant 0 : i32
    %c0_i32_1 = arith.constant 0 : i32
    return %arg0, %c0_i32, %c0_i32_0 : i32, i32, i32
  }
  func.func @transform_6(%arg0: i32) -> (i32, i32, i32) {
    %c0_i32 = arith.constant 0 : i32
    %c0_i32_0 = arith.constant 0 : i32
    %c0_i32_1 = arith.constant 0 : i32
    return %arg0, %c0_i32, %c0_i32_0 : i32, i32, i32
  }
}

</mosaic_0001>

<bundles_post_ra>
// kernel: tpu_custom_call.1
= control target key start
LH: loop header
LB: loop body
LE: loop exit
PB: predicated region body
PF: predicated region fallthrough
CT: control target
= control target key end

     0   :  { %s1100_s21 = smov 0   ;;  %s1237_s0 = inlined_call_operand.vmem [shape: f32[2,35,32], index: 0, kind: input, shape index: {}]   ;;  %s1238_s1 = inlined_call_operand.vmem [shape: f32[32,128], index: 1, kind: input, shape index: {}]   ;;  %s1239_s2 = inlined_call_operand.vmem [shape: f32[1,128], index: 2, kind: input, shape index: {}]   ;;  %s1240_s3 = inlined_call_operand.vmem [shape: f32[32,128], index: 3, kind: input, shape index: {}]   ;;  %s1241_s4 = inlined_call_operand.vmem [shape: f32[1,128], index: 4, kind: input, shape index: {}]   ;;  %s1242_s5 = inlined_call_operand.vmem [shape: f32[2,20,128], index: 5, kind: output, shape index: {0}]   ;;  %s1243_s6 = inlined_call_operand.vmem [shape: f32[2,128,35], index: 6, kind: output, shape index: {1}]  }
   0x1 LB: > { %s859_s22 = sadd.s32 4294967295, %s1060_s21   ;;  %p863_p0 = scmp.ge.s32.totalorder %s1060_s21, 1  ;;  %s1060_s21 = sphi %s1100_s21, %s17_s21  }
   0x2   : > { %p215_p1 = scmp.lt.s32.totalorder %s1060_s21, 3 }
   0x4   : > { %p216_p2 = pnand %p863_p0, %p215_p1 }
   0x5   : > { %v265_v0 = vld [vmem:[%s1238_s1] sm:$0xff] (!%p216_p2)  ;;  %v266_v1 = vld [vmem:[%s1238_s1 + $0x8] sm:$0xff] (!%p216_p2)  ;;  %v267_v2 = vld [vmem:[%s1238_s1 + $0x10] sm:$0xff] (!%p216_p2)  ;;  %v1062_v3 = vmov (!%p216_p2), 0.0|0.0   ;;  %vm1063_vm0 = vmmov (!%p216_p2), 0   ;;  %v1064_v6 = vmov (!%p216_p2), 0.0  }
   0x6   : > { %219 = sbr.rel (%p216_p2) target bundleno = 899 (0x383), region = 40  ;;  %1009 = vmatprep.subr.bf16.mxu0 (!%p216_p2), %v1062_v3  ;;  %v1010_v4 = vpack.c.bf16 (!%p216_p2), %v266_v1, %v265_v0  ;;  %v268_v5 = vld [vmem:[%s1238_s1 + $0x18] sm:$0xff] (!%p216_p2)  ;;  %943 = vmatprep.mubr.msk.f32.mxu0 (!%p216_p2), %vm1063_vm0, %v1064_v6  ;;  %p250_p3 = scmp.lt.s32.totalorder (!%p216_p2), %s859_s22, 1  ;;  %vm286_vm1 = vcmask (!%p216_p2), 261120   ;;  %vm392_vm2 = vcmask (!%p216_p2), 1042432   ;;  %vm468_vm3 = vcmask (!%p216_p2), 285696  }
   0x7   : > { %v1013_v7 = vpack.c.bf16 (!%p216_p2), %v268_v5, %v267_v2  ;;  %v868_v21 = vld [vmem:[%s1239_s2] ss:$0 sm:$0xff] (!%p216_p2) }
   0x8   : > { %1011 = vmatpush3.bf16.msra.mxu0 (!%p216_p2), %v1010_v4 }
   0x9   : > { %1012 = vmatprep.subr.bf16.mxu0 (!%p216_p2), %v1062_v3 }
   0xc   : > { %1014 = vmatpush3.bf16.msra.mxu0 (!%p216_p2), %v1013_v7 }
   0xd   : > { %s1245_s22 = smov (!%p250_p3, %s859_s22), 1  ;;  %1023 = vmatprep.subr.bf16.mxu0 %v1062_v3 }
   0xe   : > { %s1029_s7 = smul.u32 40, %s1245_s22  ;;  %s897_s17 = sshll.u32 %s1245_s22, 7 }
   0xf   : > { %s1164_s20 = scalar_lea.vmem %s1243_s6, %s897_s17  ;;  %s1030_s27 = smul.u32 24, %s1245_s22 }
  0x10   : > { %s254_s10 = scalar_lea.vmem %s1237_s0, %s1029_s7 }
  0x11   : > { %v275_v8 = vld [vmem:[%s254_s10] sm:$0xff]  ;;  %v276_v9 = vld [vmem:[%s254_s10 + $0x8] sm:$0xff]  ;;  %v277_v10 = vld [vmem:[%s254_s10 + $0x10] sm:$0xff]  ;;  %s259_s8 = scalar_lea.vmem %s1242_s5, %s1030_s27 }
  0x12   : > { %944 = vmatmul.mubr.msk.f32.vlgmr.msra.gmra.mrb[0].mxu0 %vm286_vm1, %v275_v8  ;;  %v278_v11 = vld [vmem:[%s254_s10 + $0x18] sm:$0xff]  ;;  %v279_v12 = vld [vmem:[%s254_s10 + $0x20] sm:$0x7]  ;;  %v1015_v13 = vpack.c.bf16 %v276_v9, %v275_v8 }
  0x13   : > { %946 = vmatprep.mubr.msk.f32.mxu0 %vm1063_vm0, %v1064_v6  ;;  %v1019_v14 = vpack.c.bf16 %v278_v11, %v277_v10 }
  0x14   : > { %1016 = vmatprep.subr.bf16.mxu1 %v1015_v13 }
  0x15   : > { %1018 = vmatpush3.bf16.msra.mxu1 %v1015_v13  ;;  %v271_v13 = vld [vmem:[%s1240_s3 + $0x8] sm:$0xff] }
  0x16   : > { %947 = vmatmul.mubr.msk.f32.gmra.mrb[2].mxu0 %vm286_vm1, %v276_v9  ;;  %1020 = vmatprep.subr.bf16.mxu1 %v1019_v14 }
  0x17   : > { %949 = vmatprep.mubr.msk.f32.mxu0 %vm1063_vm0, %v1064_v6 }
  0x19   : > { %1022 = vmatpush3.bf16.msra.mxu1 %v1019_v14 }
  0x1a   : > { %950 = vmatmul.mubr.msk.f32.gmra.mrb[4].mxu0 %vm286_vm1, %v277_v10  ;;  %966 = vmatprep.subr.msk.mxu1 %vm392_vm2, %v279_v12 }
  0x1b   : > { %952 = vmatprep.mubr.msk.f32.mxu0 %vm1063_vm0, %v1064_v6 }
  0x1d   : > { %967 = vmatpush3.msk.msra.mxu1 %vm392_vm2, %v279_v12 }
  0x1e   : > { %953 = vmatmul.mubr.msk.f32.gmra.mrb[6].mxu0 %vm286_vm1, %v278_v11 }
  0x1f   : > { %955 = vmatprep.mubr.msk.f32.mxu0 %vm1063_vm0, %v1064_v6 }
  0x22   : > { %956 = vmatmul.mubr.msk.f32.gmra.mrb[8].mxu0 %vm286_vm1, %v279_v12  ;;  %v270_v12 = vld [vmem:[%s1240_s3] sm:$0xff] }
  0x23   : > { %1000 = vmatprep.mubr.msk.f32.mxu0 %vm1063_vm0, %v1064_v6  ;;  %v1024_v14 = vpack.c.bf16 %v271_v13, %v270_v12 }
  0x25   : > { %1025 = vmatpush3.bf16.msra.mxu0 %v1024_v14 }
  0x26   : > { %1026 = vmatprep.subr.bf16.mxu0 %v1062_v3 }
  0xe5   : > { %v368_v15 = vpop.f32.mrb[0].mxu0 }
  0xe6   : > { %v945_v16 = vpop.f32.mrb[1].mxu0  ;;  %v369_v30 = vadd.f32 %v868_v21, %v368_v15 }
  0xe9   : > { %v373_v17 = vpop.f32.mrb[2].mxu0 }
  0xea   : > { %v948_v18 = vpop.f32.mrb[3].mxu0  ;;  %v374_v32 = vadd.f32 %v868_v21, %v373_v17 }
  0xed   : > { %v378_v19 = vpop.f32.mrb[4].mxu0 }
  0xee   : > { %v951_v20 = vpop.f32.mrb[5].mxu0  ;;  %v379_v23 = vadd.f32 %v868_v21, %v378_v19 }
  0xf1   : > { %v383_v22 = vpop.f32.mrb[6].mxu0 }
  0xf2   : > { %v384_v24 = vadd.f32 %v868_v21, %v383_v22  ;;  %v954_v25 = vpop.f32.mrb[7].mxu0 }
  0xf3   : > { %v273_v25 = vld [vmem:[%s1240_s3 + $0x18] sm:$0xff] }
  0xf4   : > { %v396_v26 = vmax.f32 %v379_v23, %v384_v24 }
  0xf5   : > { %v388_v27 = vpop.f32.mrb[8].mxu0 }
  0xf6   : > { %v389_v28 = vadd.f32 %v868_v21, %v388_v27  ;;  %v957_v29 = vpop.f32.mrb[9].mxu0 }
  0xf8   : > { %v393_v31 = vsel %vm392_vm2, %v389_v28, -inf }
  0xf9   : > { %v394_v33 = vmax.f32 %v369_v30, %v393_v31 }
  0xfb   : > { %v395_v34 = vmax.f32 %v394_v33, %v374_v32 }
  0xfd   : > { %v397_v35 = vmax.f32 %v395_v34, %v396_v26 }
  0xff   : > { %v398_v36 = vrot.slane %v397_v35, 4 }
 0x101   : > { %v399_v37 = vmax.f32 %v397_v35, %v398_v36 }
 0x103   : > { %v400_v38 = vrot.slane %v399_v37, 2 }
 0x105   : > { %v401_v39 = vmax.f32 %v399_v37, %v400_v38 }
 0x107   : > { %v402_v40 = vrot.slane %v401_v39, 1 }
 0x109   : > { %v403_v41 = vmax.f32 %v401_v39, %v402_v40 }
 0x10b   : > { %v405_v42 = vsub.f32 %v374_v32, %v403_v41  ;;  %v406_v43 = vsub.f32 %v379_v23, %v403_v41  ;;  %v407_v44 = vsub.f32 %v384_v24, %v403_v41  ;;  %v408_v45 = vsub.f32 %v389_v28, %v403_v41  ;;  %v272_v24 = vld [vmem:[%s1240_s3 + $0x10] sm:$0xff] }
 0x10c   : > { %v404_v46 = vsub.f32 %v369_v30, %v403_v41  ;;  %v1027_v26 = vpack.c.bf16 %v273_v25, %v272_v24 }
 0x10d   : > { %v411_v47 = vmul.f32 1.442695, %v405_v42  ;;  %v413_v49 = vmul.f32 1.442695, %v406_v43  ;;  %v417_v50 = vmul.f32 1.442695, %v408_v45 }
 0x10e   : > { %v409_v48 = vmul.f32 1.442695, %v404_v46  ;;  %v415_v51 = vmul.f32 1.442695, %v407_v44  ;;  %1028 = vmatpush3.bf16.msra.mxu0 %v1027_v26 }
 0x10f   : > { %1042 = vpow2.f32 %v411_v47 }
 0x110   : > { %1044 = vpow2.f32 %v409_v48 }
 0x111   : > { %1046 = vpow2.f32 %v413_v49 }
 0x112   : > { %1048 = vpow2.f32 %v417_v50 }
 0x113   : > { %1050 = vpow2.f32 %v415_v51 }
 0x119   : > { %v1043_v52 = vpop.eup %1042 }
 0x11a   : > { %v1045_v53 = vpop.eup %1044 }
 0x11b   : > { %v419_v54 = vadd.f32 %v1045_v53, %v1043_v52  ;;  %v1047_v55 = vpop.eup %1046 }
 0x11c   : > { %v1049_v56 = vpop.eup %1048 }
 0x11d   : > { %v420_v57 = vadd.f32 %v1047_v55, %v419_v54  ;;  %v1051_v58 = vpop.eup %1050  ;;  %v422_v60 = vsel %vm392_vm2, %v1049_v56, 0.0 }
 0x11f   : > { %v421_v59 = vadd.f32 %v1051_v58, %v420_v57 }
 0x121   : > { %v423_v61 = vadd.f32 %v422_v60, %v421_v59 }
 0x123   : > { %v424_v62 = vrot.slane %v423_v61, 4 }
 0x125   : > { %v425_v63 = vadd.f32 %v424_v62, %v423_v61 }
 0x127   : > { %v426_v0 = vrot.slane %v425_v63, 2 }
 0x129   : > { %v427_v1 = vadd.f32 %v426_v0, %v425_v63 }
 0x12b   : > { %v428_v2 = vrot.slane %v427_v1, 1 }
 0x12d   : > { %v429_v4 = vadd.f32 %v428_v2, %v427_v1 }
 0x12f   : > { %1052 = vrcp.f32 %v429_v4 }
 0x139   : > { %v1053_v5 = vpop.eup %1052 }
 0x13a   : > { %v431_v7 = vmul.f32 %v1053_v5, %v1045_v53  ;;  %v432_v8 = vmul.f32 %v1053_v5, %v1043_v52  ;;  %v433_v9 = vmul.f32 %v1053_v5, %v1047_v55  ;;  %v434_v10 = vmul.f32 %v1053_v5, %v1051_v58  ;;  %v891_v52 = vld [vmem:[%s1241_s4] ss:$0 sm:$0xff] }
 0x13b   : > { %v435_v11 = vmul.f32 %v1053_v5, %v1049_v56 }
 0x13c   : > { %436 = vxpose.xlu0.b32.start [1/5] (short) %v431_v7, 128 }
 0x140   : > { %437 = vxpose.xlu0.b32.cont [2/5] (short) %v432_v8, 128 }
 0x144   : > { %438 = vxpose.xlu0.b32.cont [3/5] (short) %v433_v9, 128 }
 0x148   : > { %439 = vxpose.xlu0.b32.cont [4/5] (short) %v434_v10, 128 }
 0x14c   : > { %440 = vxpose.xlu0.b32.end [5/5] (short) %v435_v11, 128 }
 0x1bc   : > { %v452_v15 = vpop.trf.xlu0 }
 0x1bd   : > { %469 = vst.msk [vmem:[%s1164_s20] sm:$0xff] %vm468_vm3, %v452_v15  ;;  %968 = vmatprep.mubr.msk.f32.mxu1 %vm468_vm3, %v452_v15 }
 0x1c0   : > { %v453_v16 = vpop.trf.xlu0 }
 0x1c1   : > { %470 = vst.msk [vmem:[%s1164_s20 + $0x8] sm:$0xff] %vm468_vm3, %v453_v16  ;;  %969 = vmatmul.mubr.msk.f32.vlgmr.msra.gmra.mrb[0].mxu1 %vm468_vm3, %v453_v16 }
 0x1c4   : > { %v454_v3 = vpop.trf.xlu0 }
 0x1c5   : > { %471 = vst.msk [vmem:[%s1164_s20 + $0x10] sm:$0xff] %vm468_vm3, %v454_v3  ;;  %971 = vmatprep.mubr.msk.f32.mxu1 %vm468_vm3, %v454_v3 }
 0x1c8   : > { %v455_v17 = vpop.trf.xlu0 }
 0x1c9   : > { %472 = vst.msk [vmem:[%s1164_s20 + $0x18] sm:$0xff] %vm468_vm3, %v455_v17  ;;  %972 = vmatmul.mubr.msk.f32.gmra.mrb[2].mxu1 %vm468_vm3, %v455_v17 }
 0x1cc   : > { %v456_v18 = vpop.trf.xlu0 }
 0x1cd   : > { %473 = vst.msk [vmem:[%s1164_s20 + $0x20] sm:$0xff] %vm468_vm3, %v456_v18  ;;  %974 = vmatprep.mubr.msk.f32.mxu1 %vm468_vm3, %v456_v18 }
 0x1d0   : > { %v457_v19 = vpop.trf.xlu0 }
 0x1d1   : > { %474 = vst.msk [vmem:[%s1164_s20 + $0x28] sm:$0xff] %vm468_vm3, %v457_v19  ;;  %975 = vmatmul.mubr.msk.f32.gmra.mrb[4].mxu1 %vm468_vm3, %v457_v19 }
 0x1d4   : > { %v458_v20 = vpop.trf.xlu0 }
 0x1d5   : > { %475 = vst.msk [vmem:[%s1164_s20 + $0x30] sm:$0xff] %vm468_vm3, %v458_v20  ;;  %977 = vmatprep.mubr.msk.f32.mxu1 %vm468_vm3, %v458_v20 }
 0x1d8   : > { %v459_v21 = vpop.trf.xlu0 }
 0x1d9   : > { %476 = vst.msk [vmem:[%s1164_s20 + $0x38] sm:$0xff] %vm468_vm3, %v459_v21  ;;  %978 = vmatmul.mubr.msk.f32.gmra.mrb[6].mxu1 %vm468_vm3, %v459_v21 }
 0x1dc   : > { %v460_v22 = vpop.trf.xlu0 }
 0x1dd   : > { %477 = vst.msk [vmem:[%s1164_s20 + $0x40] sm:$0xff] %vm468_vm3, %v460_v22  ;;  %980 = vmatprep.mubr.msk.f32.mxu1 %vm468_vm3, %v460_v22 }
 0x1e0   : > { %v461_v23 = vpop.trf.xlu0 }
 0x1e1   : > { %478 = vst.msk [vmem:[%s1164_s20 + $0x48] sm:$0xff] %vm468_vm3, %v461_v23  ;;  %981 = vmatmul.mubr.msk.f32.gmra.mrb[8].mxu1 %vm468_vm3, %v461_v23 }
 0x1e4   : > { %v462_v27 = vpop.trf.xlu0 }
 0x1e5   : > { %479 = vst.msk [vmem:[%s1164_s20 + $0x50] sm:$0xff] %vm468_vm3, %v462_v27  ;;  %983 = vmatprep.mubr.msk.f32.mxu1 %vm468_vm3, %v462_v27 }
 0x1e8   : > { %v463_v28 = vpop.trf.xlu0 }
 0x1e9   : > { %480 = vst.msk [vmem:[%s1164_s20 + $0x58] sm:$0xff] %vm468_vm3, %v463_v28  ;;  %984 = vmatmul.mubr.msk.f32.gmra.mrb[10].mxu1 %vm468_vm3, %v463_v28 }
 0x1ec   : > { %v464_v29 = vpop.trf.xlu0 }
 0x1ed   : > { %481 = vst.msk [vmem:[%s1164_s20 + $0x60] sm:$0xff] %vm468_vm3, %v464_v29  ;;  %986 = vmatprep.mubr.msk.f32.mxu1 %vm468_vm3, %v464_v29 }
 0x1f0   : > { %v465_v30 = vpop.trf.xlu0 }
 0x1f1   : > { %482 = vst.msk [vmem:[%s1164_s20 + $0x68] sm:$0xff] %vm468_vm3, %v465_v30  ;;  %987 = vmatmul.mubr.msk.f32.gmra.mrb[12].mxu1 %vm468_vm3, %v465_v30 }
 0x1f4   : > { %v466_v31 = vpop.trf.xlu0 }
 0x1f5   : > { %483 = vst.msk [vmem:[%s1164_s20 + $0x70] sm:$0xff] %vm468_vm3, %v466_v31  ;;  %989 = vmatprep.mubr.msk.f32.mxu1 %vm468_vm3, %v466_v31 }
 0x1f8   : > { %v467_v32 = vpop.trf.xlu0 }
 0x1f9   : > { %484 = vst.msk [vmem:[%s1164_s20 + $0x78] sm:$0xff] %vm468_vm3, %v467_v32  ;;  %990 = vmatmul.mubr.msk.f32.gmra.mrb[14].mxu1 %vm468_vm3, %v467_v32 }
 0x294   : > { %v970_v33 = vpop.f32.mrb[0].mxu1 }
 0x295   : > { %v601_v34 = vpop.f32.mrb[1].mxu1 }
 0x29c   : > { %v973_v35 = vpop.f32.mrb[2].mxu1 }
 0x29d   : > { %v670_v36 = vadd.f32 %v973_v35, %v601_v34  ;;  %v611_v37 = vpop.f32.mrb[3].mxu1 }
 0x29f   : > { %1001 = vmatmul.mubr.msk.f32.vlgmr.msra.gmra.mrb[10].mxu0 %vm286_vm1, %v670_v36 }
 0x2a0   : > { %1003 = vmatprep.mubr.msk.f32.mxu0 %vm1063_vm0, %v1064_v6 }
 0x2a4   : > { %v976_v38 = vpop.f32.mrb[4].mxu1 }
 0x2a5   : > { %v672_v39 = vadd.f32 %v976_v38, %v611_v37  ;;  %v621_v40 = vpop.f32.mrb[5].mxu1 }
 0x2a6   : > { %v671_v41 = vadd.f32 %v970_v33, %v621_v40 }
 0x2a8   : > { %1004 = vmatmul.mubr.msk.f32.gmra.mrb[12].mxu0 %vm286_vm1, %v671_v41 }
 0x2a9   : > { %1006 = vmatprep.mubr.msk.f32.mxu0 %vm1063_vm0, %v1064_v6 }
 0x2ac   : > { %1007 = vmatmul.mubr.msk.f32.gmra.mrb[14].mxu0 %vm286_vm1, %v672_v39  ;;  %v979_v42 = vpop.f32.mrb[6].mxu1 }
 0x2ad   : > { %v631_v43 = vpop.f32.mrb[7].mxu1 }
 0x2b4   : > { %v982_v44 = vpop.f32.mrb[8].mxu1 }
 0x2b5   : > { %v639_v45 = vpop.f32.mrb[9].mxu1 }
 0x2bc   : > { %v985_v46 = vpop.f32.mrb[10].mxu1 }
 0x2bd   : > { %v647_v47 = vpop.f32.mrb[11].mxu1 }
 0x2c4   : > { %v988_v48 = vpop.f32.mrb[12].mxu1 }
 0x2c5   : > { %v655_v49 = vpop.f32.mrb[13].mxu1 }
 0x2cc   : > { %v991_v50 = vpop.f32.mrb[14].mxu1 }
 0x2cd   : > { %v663_v51 = vpop.f32.mrb[15].mxu1 }
 0x372   : > { %v754_v6 = vpop.f32.mrb[10].mxu0 }
 0x373   : > { %v755_v53 = vadd.f32 %v891_v52, %v754_v6  ;;  %v1002_v54 = vpop.f32.mrb[11].mxu0 }
 0x375   : > { %768 = vst [vmem:[%s259_s8] sm:$0xff] %v755_v53 }
 0x37b   : > { %v759_v55 = vpop.f32.mrb[12].mxu0 }
 0x37c   : > { %v760_v56 = vadd.f32 %v891_v52, %v759_v55  ;;  %v1005_v57 = vpop.f32.mrb[13].mxu0 }
 0x37e   : > { %769 = vst [vmem:[%s259_s8 + $0x8] sm:$0xff] %v760_v56 }
 0x37f   : > { %v764_v58 = vpop.f32.mrb[14].mxu0 }
 0x380   : > { %v765_v59 = vadd.f32 %v891_v52, %v764_v58  ;;  %v1008_v60 = vpop.f32.mrb[15].mxu0 }
 0x382   : > { %770 = vst [vmem:[%s259_s8 + $0x10] sm:$0xf] %v765_v59 }
 0x383 PF: > { %s17_s21 = sadd.s32 1, %s1060_s21  }
 0x384   : > { %p14_p4 = scmp.ge.s32.totalorder %s17_s21, 4  }
 0x386   :  { %16 = sbr.rel (!%p14_p4) target bundleno = 1 (0x1), region = 82 }

</bundles_post_ra>
